<compile_context>
chip_gen: v6e
topology: v6e:2x2x1
jax: 0.10.0
libtpu: 0.0.40
codegen_flags: <defaults>
</compile_context>

<pallas_src>
import jax
import jax.numpy as jnp
from jax.experimental import pallas as pl
from jax.experimental.pallas import tpu as pltpu

_LANES = 1024          # lane-dense block width (multiple of 128)
_MAX_TILE_ROWS = 512   # row-tile cap -> (512, 1024) f32 block = 2 MiB / stream


def _multi_task_loss_kernel(alpha_ref, l1_ref, l2_ref, out_ref):
    # alpha_ref: (1,) f32 in SMEM, ALREADY sigmoid-activated in the wrapper.
    a = alpha_ref[0]
    l1 = l1_ref[...].astype(jnp.float32)
    l2 = l2_ref[...].astype(jnp.float32)
    out_ref[...] = (a * l1 + (1.0 - a) * l2).astype(out_ref.dtype)


def multi_task_loss(alpha_param, loss1, loss2):
    """alpha_param: shape (1,) raw (pre-sigmoid) parameter; loss1/loss2: same shape."""
    assert loss1.shape == loss2.shape and loss1.dtype == loss2.dtype
    orig_shape = loss1.shape
    out_dtype = loss1.dtype
    n = loss1.size

    # Hoist the sigmoid out of the kernel: one O(1) XLA op, keeps the kernel
    # body a pure elementwise blend (no transcendental on the scalar path).
    alpha_act = jax.nn.sigmoid(alpha_param.astype(jnp.float32)).reshape(1)

    # Flatten to a lane-dense 2-D slab (rows, _LANES), padding the tail.
    l1 = loss1.reshape(-1)
    l2 = loss2.reshape(-1)
    pad_tail = (-n) % _LANES
    if pad_tail:
        l1 = jnp.pad(l1, (0, pad_tail))
        l2 = jnp.pad(l2, (0, pad_tail))
    rows = (n + pad_tail) // _LANES

    # Row-tile: full extent for small inputs, otherwise 512-row tiles
    # (pad rows up to a multiple of the tile so the grid divides evenly).
    tm = min(_MAX_TILE_ROWS, rows)
    pad_rows = (-rows) % tm
    if pad_rows:
        l1 = jnp.pad(l1, (0, pad_rows * _LANES))
        l2 = jnp.pad(l2, (0, pad_rows * _LANES))
        rows += pad_rows
    l1 = l1.reshape(rows, _LANES)
    l2 = l2.reshape(rows, _LANES)

    grid = (rows // tm,)
    itemsize = jnp.dtype(out_dtype).itemsize

    out = pl.pallas_call(
        _multi_task_loss_kernel,
        out_shape=jax.ShapeDtypeStruct((rows, _LANES), out_dtype),
        grid_spec=pltpu.PrefetchScalarGridSpec(
            num_scalar_prefetch=0,
            grid=grid,
            in_specs=[
                # alpha: tiny (1,) scalar, resident in SMEM for every step.
                pl.BlockSpec((1,), lambda i: (0,),
                             memory_space=pltpu.MemorySpace.SMEM),
                pl.BlockSpec((tm, _LANES), lambda i: (i, 0)),
                pl.BlockSpec((tm, _LANES), lambda i: (i, 0)),
            ],
            out_specs=pl.BlockSpec((tm, _LANES), lambda i: (i, 0)),
        ),
        compiler_params=pltpu.CompilerParams(
            dimension_semantics=("parallel",),   # shard grid across 2 TCs on v7x
            vmem_limit_bytes=32 << 20,           # ~12 MiB resident; safe on v5e/v6e/v7x
        ),
        cost_estimate=pl.CostEstimate(
            flops=3 * n,
            transcendentals=0,
            bytes_accessed=3 * n * itemsize,
        ),
    )(alpha_act, l1, l2)

    return out.reshape(-1)[:n].reshape(orig_shape)


if __name__ == "__main__":
    key = jax.random.PRNGKey(0)
    k_a, k1, k2 = jax.random.split(key, 3)

    # Deterministic parameter init (torch.Tensor(1) is uninitialized in the
    # original module; we initialize it from the PRNG instead).
    alpha_param = jax.random.normal(k_a, (1,), dtype=jnp.float32)

    # Small elementwise loss maps (batch=2, channels=4, spatial=16x16).
    B, C, H, W = 2, 4, 16, 16
    loss1 = jax.random.uniform(k1, (B, C, H, W), dtype=jnp.float32)
    loss2 = jax.random.uniform(k2, (B, C, H, W), dtype=jnp.float32)

    out = multi_task_loss(alpha_param, loss1, loss2)
    out = jax.block_until_ready(out)

    # Pure-JAX reference check.
    a = jax.nn.sigmoid(alpha_param[0])
    ref = a * loss1 + (1.0 - a) * loss2
    assert out.shape == ref.shape
    assert jnp.allclose(out, ref, atol=1e-6, rtol=1e-6), "mismatch vs reference"

    print("KERNEL_OK")
</pallas_src>

<mosaic_0001>
module attributes {stable_mosaic.version = 11 : i64} {
  func.func @_multi_task_loss_kernel(%arg0: i32, %arg1: memref<1xf32, #tpu.memory_space<smem>>, %arg2: memref<2x1024xf32, #tpu.memory_space<vmem>>, %arg3: memref<2x1024xf32, #tpu.memory_space<vmem>>, %arg4: memref<2x1024xf32, #tpu.memory_space<vmem>>) attributes {dimension_semantics = [#tpu.dimension_semantics<parallel>], iteration_bounds = array<i64: 1>, scalar_prefetch = 0 : i64, scratch_operands = 0 : i64, tpu.core_type = #tpu.core_type<tc>, window_params = [{transform_indices = @transform_0, window_bounds = array<i64: 1>}, {transform_indices = @transform_1, window_bounds = array<i64: 2, 1024>}, {transform_indices = @transform_2, window_bounds = array<i64: 2, 1024>}, {transform_indices = @transform_3, window_bounds = array<i64: 2, 1024>}]} {
    %c0 = arith.constant 0 : index
    %0 = memref.load %arg1[%c0] : memref<1xf32, #tpu.memory_space<smem>>
    %c0_0 = arith.constant 0 : index
    %c0_1 = arith.constant 0 : index
    %1 = vector.load %arg2[%c0_0, %c0_1] : memref<2x1024xf32, #tpu.memory_space<vmem>>, vector<2x1024xf32>
    %c0_2 = arith.constant 0 : index
    %c0_3 = arith.constant 0 : index
    %2 = vector.load %arg3[%c0_2, %c0_3] : memref<2x1024xf32, #tpu.memory_space<vmem>>, vector<2x1024xf32>
    %3 = vector.broadcast %0 : f32 to vector<2x1024xf32>
    %4 = arith.mulf %3, %1 : vector<2x1024xf32>
    %cst = arith.constant 1.000000e+00 : f32
    %5 = arith.subf %cst, %0 : f32
    %6 = vector.broadcast %5 : f32 to vector<2x1024xf32>
    %7 = arith.mulf %6, %2 : vector<2x1024xf32>
    %8 = arith.addf %4, %7 : vector<2x1024xf32>
    %c0_4 = arith.constant 0 : index
    %c0_5 = arith.constant 0 : index
    %9 = vector.load %arg4[%c0_4, %c0_5] : memref<2x1024xf32, #tpu.memory_space<vmem>>, vector<2x1024xf32>
    tpu.vector_store %arg4[%c0_4, %c0_5], %8 {strides = array<i32>} : memref<2x1024xf32, #tpu.memory_space<vmem>>, vector<2x1024xf32>,
    return
  }
  func.func @transform_0(%arg0: i32) -> i32 {
    %c0_i32 = arith.constant 0 : i32
    %c0_i32_0 = arith.constant 0 : i32
    return %c0_i32 : i32
  }
  func.func @transform_1(%arg0: i32) -> (i32, i32) {
    %c0_i32 = arith.constant 0 : i32
    %c0_i32_0 = arith.constant 0 : i32
    return %arg0, %c0_i32 : i32, i32
  }
  func.func @transform_2(%arg0: i32) -> (i32, i32) {
    %c0_i32 = arith.constant 0 : i32
    %c0_i32_0 = arith.constant 0 : i32
    return %arg0, %c0_i32 : i32, i32
  }
  func.func @transform_3(%arg0: i32) -> (i32, i32) {
    %c0_i32 = arith.constant 0 : i32
    %c0_i32_0 = arith.constant 0 : i32
    return %arg0, %c0_i32 : i32, i32
  }
}

</mosaic_0001>

<bundles_post_ra>
// kernel: tpu_custom_call.1
= control target key start
LH: loop header
LB: loop body
LE: loop exit
PB: predicated region body
PF: predicated region fallthrough
CT: control target
= control target key end

     0   :  { %9 = vsyncpa [#allocation4], 0  ;;  %s179_s0 = inlined_call_operand.<no memory space> [shape: f32[1], index: 0, kind: input, shape index: {}]   ;;  %s180_s1 = inlined_call_operand.hbm [shape: f32[2,1024], index: 1, kind: input, shape index: {}]   ;;  %s181_s2 = inlined_call_operand.hbm [shape: f32[2,1024], index: 2, kind: input, shape index: {}]   ;;  %s182_s3 = inlined_call_operand.hbm [shape: f32[2,1024], index: 3, kind: output, shape index: {}]  }
   0x1   :  { %10 = vsyncpa [#allocation7], 0 }
   0x2   :  { %11 = vsyncpa [#allocation5], 0  ;;  %s141_s12 = smov [#allocation3]   ;;  %s142_s14 = smov [#allocation6]  }
   0x3   :  { %s20_s13 = sshll.u32 %s141_s12, 4  ;;  %s30_s15 = sshll.u32 %s142_s14, 4  ;;  %s21_s13 = int_to_ptr.vmem [resolvable:$true] %s20_s13  ;;  %s31_s15 = int_to_ptr.vmem [resolvable:$true] %s30_s15 }
   0x4   :  { %s83_s16 = scalar_lea.vmem %s21_s13, 256  ;;  %p88_p1 = scmp.lt.s32.totalorder %s21_s13, %s21_s13 }
   0x5   :  { %p84_p0 = scmp.ne.s32.totalorder %s21_s13, %s83_s16  ;;  %p89_p2 = scmp.lt.s32.totalorder %s83_s16, %s83_s16 }
   0x7   :  { %p90_p3 = por %p89_p2, %p88_p1 }
   0x9   :  { %p91_p4 = pnand %p90_p3, %p84_p0 }
   0xb   :  { %94 = shalt.err (!%p91_p4)
}
   0xc   :  { %23 = dma.hbm_to_vmem [thread:$0]  %s180_s1, 256, %s21_s13, [#allocation4]  }
   0xd   :  { %s103_s19 = scalar_lea.vmem %s31_s15, 256  ;;  %p108_p6 = scmp.lt.s32.totalorder %s31_s15, %s31_s15 }
   0xe   :  { %p104_p5 = scmp.ne.s32.totalorder %s31_s15, %s103_s19  ;;  %p109_p7 = scmp.lt.s32.totalorder %s103_s19, %s103_s19 }
  0x10   :  { %p110_p8 = por %p109_p7, %p108_p6 }
  0x12   :  { %p111_p9 = pnand %p110_p8, %p104_p5 }
  0x14   :  { %114 = shalt.err (!%p111_p9)
}
  0x15   :  { %33 = dma.hbm_to_vmem [thread:$0]  %s181_s2, 256, %s31_s15, [#allocation7]  }
  0x16   :  { %135 = dma.done.wait [#allocation4], 256  }
  0x17   :  { %136 = vsyncadd [#allocation4], 4294967040 }
  0x18   :  { %137 = dma.done.wait [#allocation7], 256  }
  0x19   :  { %138 = vsyncadd [#allocation7], 4294967040  ;;  %s48_s24 = ssub.f32 1.0, %s179_s0  ;;  %v45_v0 = vstv %s179_s0  ;;  %v41_v2 = vld [vmem:[#allocation3] sm:$0xff]  ;;  %v43_v3 = vld [vmem:[#allocation6] sm:$0xff]  ;;  %s143_s2 = smov [#allocation8]  }
  0x1a   :  { %v42_v4 = vld [vmem:[#allocation3 + $0x8] sm:$0xff]  ;;  %v46_v5 = vmul.f32 %v45_v0, %v41_v2  ;;  %v44_v7 = vld [vmem:[#allocation6 + $0x8] sm:$0xff]  ;;  %s62_s26 = sshll.u32 %s143_s2, 4  ;;  %s63_s26 = int_to_ptr.vmem [resolvable:$true] %s62_s26 }
  0x1b   :  { %v49_v1 = vstv %s48_s24  ;;  %v47_v8 = vmul.f32 %v45_v0, %v42_v4  ;;  %s115_s27 = scalar_lea.vmem %s63_s26, 256  ;;  %p120_p11 = scmp.lt.s32.totalorder %s63_s26, %s63_s26 }
  0x1c   :  { %v50_v6 = vmul.f32 %v49_v1, %v43_v3  ;;  %v51_v9 = vmul.f32 %v49_v1, %v44_v7  ;;  %p116_p10 = scmp.ne.s32.totalorder %s63_s26, %s115_s27  ;;  %p121_p12 = scmp.lt.s32.totalorder %s115_s27, %s115_s27 }
  0x1e   :  { %v52_v10 = vadd.f32 %v50_v6, %v46_v5  ;;  %v53_v11 = vadd.f32 %v51_v9, %v47_v8  ;;  %p122_p13 = por %p121_p12, %p120_p11 }
  0x20   :  { %54 = vst [vmem:[#allocation8] sm:$0xff] %v52_v10  ;;  %55 = vst [vmem:[#allocation8 + $0x8] sm:$0xff] %v53_v11  ;;  %p123_p0 = pnand %p122_p13, %p116_p10 }
  0x22   :  { %126 = shalt.err (!%p123_p0)
}
  0x23   :  { %65 = dma.vmem_to_hbm [thread:$0]  %s63_s26, 256, %s182_s3, [#allocation5]  }
  0x24   :  { %139 = dma.done.wait [#allocation5], 256  }
  0x25   :  { %140 = vsyncadd [#allocation5], 4294967040 }
  0x26   :  { %69 = vsyncpa [#allocation4], 1 }
  0x27   :  { %70 = vsyncpa [#allocation7], 1 }
  0x28   :  { %71 = vsyncpa [#allocation5], 1 }

</bundles_post_ra>
